<compile_context>
chip_gen: v7x
topology: tpu7x:2x2x1
jax: 0.10.0
libtpu: 0.0.40
codegen_flags: <defaults>
</compile_context>

<pallas_src>
import jax
import jax.numpy as jnp
from jax.experimental import pallas as pl
from jax.experimental.pallas import tpu as pltpu  # noqa: F401  (used by the scaled-up variant)


def cat3_relu_kernel(x_ref, o_ref):
    """x_ref: (B, C, W) -> o_ref: (B, C, 3*W) == relu(cat([x, x, x], dim=2))."""
    # ReLU commutes with concat, so apply it once on the small input tile,
    # then a single 3-way concat along the lane (last) axis and one store.
    xr = jnp.maximum(x_ref[...], jnp.zeros((), x_ref.dtype))
    o_ref[...] = jnp.concatenate([xr, xr, xr], axis=-1)


def model_forward(x):
    B, C, W = x.shape
    y = pl.pallas_call(
        cat3_relu_kernel,
        out_shape=jax.ShapeDtypeStruct((B, C, 3 * W), x.dtype),
        # Full-array blocks, single grid point; the whole problem fits in a
        # couple of vregs, so any grid/tiling only adds per-step overhead.
        in_specs=[pl.BlockSpec((B, C, W), lambda: (0, 0, 0))],
        out_specs=pl.BlockSpec((B, C, 3 * W), lambda: (0, 0, 0)),
    )(x)
    # Row-major flatten of the contiguous (B, C, 3*W) result reproduces
    # torch's `.view(B, -1)` ordering exactly; done outside the kernel.
    return y.reshape(B, -1)


if __name__ == "__main__":
    key = jax.random.PRNGKey(0)
    x = jax.random.normal(key, (2, 3, 4), dtype=jnp.float32)

    out = jax.jit(model_forward)(x)
    jax.block_until_ready(out)

    # Pure-JAX reference of the torch module.
    ref = jnp.maximum(
        jnp.concatenate([x, x, x], axis=2).reshape(x.shape[0], -1), 0.0)
    assert out.shape == (2, 36), out.shape
    assert jnp.allclose(out, ref), "mismatch vs reference"

    print("KERNEL_OK")
</pallas_src>

<mosaic_0001>
module attributes {stable_mosaic.version = 11 : i64} {
  func.func @cat3_relu_kernel(%arg0: memref<2x3x4xf32, #tpu.memory_space<vmem>>, %arg1: memref<2x3x12xf32, #tpu.memory_space<vmem>>) attributes {dimension_semantics = [], scalar_prefetch = 0 : i64, scratch_operands = 0 : i64, tpu.core_type = #tpu.core_type<tc>} {
    %c0 = arith.constant 0 : index
    %c0_0 = arith.constant 0 : index
    %c0_1 = arith.constant 0 : index
    %0 = vector.load %arg0[%c0, %c0_0, %c0_1] : memref<2x3x4xf32, #tpu.memory_space<vmem>>, vector<2x3x4xf32>
    %cst = arith.constant 0.000000e+00 : f32
    %1 = vector.broadcast %cst : f32 to vector<2x3x4xf32>
    %2 = arith.maximumf %0, %1 : vector<2x3x4xf32>
    %3 = tpu.concatenate %2, %2, %2 in 2 : vector<2x3x4xf32>, vector<2x3x4xf32>, vector<2x3x4xf32> -> vector<2x3x12xf32>
    %c0_2 = arith.constant 0 : index
    %c0_3 = arith.constant 0 : index
    %c0_4 = arith.constant 0 : index
    %4 = vector.load %arg1[%c0_2, %c0_3, %c0_4] : memref<2x3x12xf32, #tpu.memory_space<vmem>>, vector<2x3x12xf32>
    tpu.vector_store %arg1[%c0_2, %c0_3, %c0_4], %3 {strides = array<i32>} : memref<2x3x12xf32, #tpu.memory_space<vmem>>, vector<2x3x12xf32>,
    return
  }
}

</mosaic_0001>

<bundles_post_ra>
// kernel: model_forward.1
= control target key start
LH: loop header
LB: loop body
LE: loop exit
PB: predicated region body
PF: predicated region fallthrough
CT: control target
= control target key end

     0   :  { %s41_s10 = smov 4   ;;  %s42_s11 = smov 8   ;;  %vm26_vm0 = vcmask 31744   ;;  %vm29_vm1 = vcmask 64512   ;;  %vm32_vm2 = vcmask 92160   ;;  %s65_s0 = inlined_call_operand.vmem [shape: f32[2,3,4], index: 0, kind: input, shape index: {}]   ;;  %s66_s1 = inlined_call_operand.vmem [shape: f32[2,3,12], index: 1, kind: output, shape index: {}]  }
   0x1   :  { %v8_v0 = vld [vmem:[%s65_s0] sm:$0x7]  ;;  %v9_v1 = vld [vmem:[%s65_s0 + $0x4] sm:$0x7] }
   0x2   :  { %v10_v2 = vmax.f32 %v8_v0, 0.0  ;;  %v11_v3 = vmax.f32 %v9_v1, 0.0 }
   0x4   :  { %14 = vrot.lane.b32.xlu0 %v10_v2, %s41_s10  ;;  %20 = vrot.lane.b32.xlu1 %v10_v2, %s42_s11 }
   0x8   :  { %16 = vrot.lane.b32.xlu0 %v11_v3, %s41_s10  ;;  %22 = vrot.lane.b32.xlu1 %v11_v3, %s42_s11 }
  0x76   :  { %v15_v4 = vpop.permute.xlu0 %14  ;;  %v21_v5 = vpop.permute.xlu1 %20 }
  0x77   :  { %v27_v6 = vsel %vm26_vm0, %v10_v2, %v15_v4 }
  0x78   :  { %v30_v7 = vsel %vm29_vm1, %v27_v6, %v21_v5 }
  0x79   :  { %33 = vst.msk [vmem:[%s66_s1] sm:$0x7] %vm32_vm2, %v30_v7 }
  0x7a   :  { %v17_v8 = vpop.permute.xlu0 %16  ;;  %v23_v9 = vpop.permute.xlu1 %22 }
  0x7b   :  { %v28_v10 = vsel %vm26_vm0, %v11_v3, %v17_v8 }
  0x7c   :  { %v31_v11 = vsel %vm29_vm1, %v28_v10, %v23_v9 }
  0x7d   :  { %34 = vst.msk [vmem:[%s66_s1 + $0x4] sm:$0x7] %vm32_vm2, %v31_v11 }

</bundles_post_ra>
